<compile_context>
chip_gen: v7x
topology: tpu7x:2x2x1
jax: 0.10.0
libtpu: 0.0.40
codegen_flags: <defaults>
</compile_context>

<pallas_src>
import functools

import jax
import jax.numpy as jnp
from jax.experimental import pallas as pl
from jax.experimental.pallas import tpu as pltpu

_LANE = 128
_SUBLANE = 8


def _round_up(v, m):
    return ((v + m - 1) // m) * m


def _vmem_capacity_bytes():
    try:
        cap = getattr(pltpu.get_tpu_info(), "vmem_capacity_bytes", None)
        if cap:
            return int(cap)
    except Exception:
        pass
    return 64 << 20  # conservative fallback: v7x per-TensorCore VMEM


# ---------------------------------------------------------------------------
# Fused path: full time axis resident per block, (TB, T, TC) tiles.
# ---------------------------------------------------------------------------
def _fused_kernel(x_ref, o_ref, *, eps, inv_t):
    # x block: (TB, T, TC) -- time on sublanes (reduction axis), channels on lanes.
    xf = x_ref[...].astype(jnp.float32)                      # single upcast per element
    mean = jnp.sum(xf, axis=1, keepdims=True) * inv_t        # (TB, 1, TC)
    centered = xf - mean
    var = jnp.sum(centered * centered, axis=1, keepdims=True) * inv_t   # centered (2-pass)
    inv_std = jax.lax.rsqrt(var + eps)                       # EUP rsqrt, one per (b, c)
    o_ref[...] = (centered * inv_std).astype(o_ref.dtype)


def _fused_path(x, eps, target_bytes, vmem_cap):
    B, T, C = x.shape
    itemsize = jnp.dtype(x.dtype).itemsize
    c_up = _round_up(C, _LANE)

    # Channels first (lane-dense, contiguous DMA rows), then widen along batch.
    tc = min(c_up, max(_LANE, (target_bytes // (T * itemsize)) // _LANE * _LANE))
    tb = max(1, min(B, target_bytes // (T * tc * itemsize)))

    # v7x megacore: keep at least two grid steps when there is work to split.
    if pl.cdiv(B, tb) * pl.cdiv(C, tc) == 1:
        if B >= 2:
            tb = -(-B // 2)
        elif c_up >= 2 * _LANE:
            tc = _round_up(-(-c_up // 2), _LANE)

    grid = (pl.cdiv(B, tb), pl.cdiv(C, tc))

    blk = tb * T * tc * itemsize
    blk_f32 = tb * T * tc * 4
    need = 4 * blk + 3 * blk_f32 + (4 << 20)          # 2x in + 2x out buffers + f32 temps
    vmem_limit = int(min(max(need, 32 << 20), vmem_cap * 3 // 4))

    cost = pl.CostEstimate(
        flops=int(7 * B * T * C),
        transcendentals=int(B * C),
        bytes_accessed=int(2 * B * T * C * itemsize),
    )
    kernel = functools.partial(_fused_kernel, eps=float(eps), inv_t=1.0 / T)

    return pl.pallas_call(
        kernel,
        out_shape=jax.ShapeDtypeStruct((B, T, C), x.dtype),
        grid_spec=pltpu.PrefetchScalarGridSpec(
            num_scalar_prefetch=0,
            grid=grid,
            in_specs=[pl.BlockSpec((tb, T, tc), lambda b, c: (b, 0, c))],
            out_specs=pl.BlockSpec((tb, T, tc), lambda b, c: (b, 0, c)),
        ),
        compiler_params=pltpu.CompilerParams(
            dimension_semantics=("parallel", "parallel"),
            vmem_limit_bytes=vmem_limit,
        ),
        cost_estimate=cost,
    )(x)


# ---------------------------------------------------------------------------
# Large-T fallback: time-tiled stats pass + time-tiled normalize pass.
# ---------------------------------------------------------------------------
def _stats_kernel(x_ref, mean_ref, rstd_ref, *, eps, inv_t, t_total, tt):
    t = pl.program_id(2)

    @pl.when(t == 0)
    def _():
        mean_ref[...] = jnp.zeros_like(mean_ref)
        rstd_ref[...] = jnp.zeros_like(rstd_ref)

    xf = x_ref[...].astype(jnp.float32)                       # (TT, TC)
    rows = jax.lax.broadcasted_iota(jnp.int32, xf.shape, 0) + t * tt
    xz = jnp.where(rows < t_total, xf, 0.0)                   # mask partial tail time tile
    mean_ref[...] += jnp.sum(xz, axis=0, keepdims=True)       # running sum(x)
    rstd_ref[...] += jnp.sum(xz * xz, axis=0, keepdims=True)  # running sum(x^2)

    @pl.when(t == pl.num_programs(2) - 1)
    def _():
        mean = mean_ref[...] * inv_t
        var = jnp.maximum(rstd_ref[...] * inv_t - mean * mean, 0.0)
        mean_ref[...] = mean
        rstd_ref[...] = jax.lax.rsqrt(var + eps)


def _apply_kernel(x_ref, mean_ref, rstd_ref, o_ref):
    xf = x_ref[...].astype(jnp.float32)
    o_ref[...] = ((xf - mean_ref[...]) * rstd_ref[...]).astype(o_ref.dtype)


def _time_tiled_path(x, eps, target_bytes, vmem_cap):
    B, T, C = x.shape
    itemsize = jnp.dtype(x.dtype).itemsize
    c_up = _round_up(C, _LANE)

    tc = min(c_up, 4 * _LANE)
    tt = max(_SUBLANE, (target_bytes // (tc * itemsize)) // _SUBLANE * _SUBLANE)
    tt = min(tt, _round_up(T, _SUBLANE))
    grid = (B, pl.cdiv(C, tc), pl.cdiv(T, tt))

    blk = tt * tc * itemsize
    blk_f32 = tt * tc * 4
    need = 4 * blk + 3 * blk_f32 + (4 << 20)
    vmem_limit = int(min(max(need, 32 << 20), vmem_cap * 3 // 4))

    stats_kernel = functools.partial(
        _stats_kernel, eps=float(eps), inv_t=1.0 / T, t_total=T, tt=tt)

    mean, rstd = pl.pallas_call(
        stats_kernel,
        out_shape=(jax.ShapeDtypeStruct((B, 1, C), jnp.float32),
                   jax.ShapeDtypeStruct((B, 1, C), jnp.float32)),
        grid_spec=pltpu.PrefetchScalarGridSpec(
            num_scalar_prefetch=0,
            grid=grid,
            in_specs=[pl.BlockSpec((pl.Squeezed(), tt, tc), lambda b, c, t: (b, t, c))],
            out_specs=[pl.BlockSpec((pl.Squeezed(), 1, tc), lambda b, c, t: (b, 0, c)),
                       pl.BlockSpec((pl.Squeezed(), 1, tc), lambda b, c, t: (b, 0, c))],
        ),
        compiler_params=pltpu.CompilerParams(
            dimension_semantics=("parallel", "parallel", "arbitrary"),
            vmem_limit_bytes=vmem_limit,
        ),
    )(x)

    out = pl.pallas_call(
        _apply_kernel,
        out_shape=jax.ShapeDtypeStruct((B, T, C), x.dtype),
        grid_spec=pltpu.PrefetchScalarGridSpec(
            num_scalar_prefetch=0,
            grid=grid,
            in_specs=[pl.BlockSpec((pl.Squeezed(), tt, tc), lambda b, c, t: (b, t, c)),
                      pl.BlockSpec((pl.Squeezed(), 1, tc), lambda b, c, t: (b, 0, c)),
                      pl.BlockSpec((pl.Squeezed(), 1, tc), lambda b, c, t: (b, 0, c))],
            out_specs=pl.BlockSpec((pl.Squeezed(), tt, tc), lambda b, c, t: (b, t, c)),
        ),
        compiler_params=pltpu.CompilerParams(
            dimension_semantics=("parallel", "parallel", "parallel"),
            vmem_limit_bytes=vmem_limit,
        ),
    )(x, mean, rstd)
    return out


def instance_norm_1d(x, eps=1e-5, max_block_bytes=None):
    """x: (batch, time, channels) -> instance-normalized tensor, same shape/dtype."""
    B, T, C = x.shape
    itemsize = jnp.dtype(x.dtype).itemsize
    vmem_cap = _vmem_capacity_bytes()
    target = (max(2 << 20, vmem_cap // 16)
              if max_block_bytes is None else int(max_block_bytes))
    # Fused path whenever a full-T, 128-lane block fits the budget; otherwise time-tile.
    if T * _LANE * itemsize <= target:
        return _fused_path(x, eps, target, vmem_cap)
    return _time_tiled_path(x, eps, target, vmem_cap)


def _reference(x, eps=1e-5):
    x32 = x.astype(jnp.float32)
    mean = jnp.mean(x32, axis=1, keepdims=True)
    var = jnp.mean((x32 - mean) ** 2, axis=1, keepdims=True)
    return ((x32 - mean) * jax.lax.rsqrt(var + eps)).astype(x.dtype)


if __name__ == "__main__":
    key = jax.random.PRNGKey(0)
    k0, k1, k2 = jax.random.split(key, 3)

    # Primary small case (batch, time, channels), fused path, single partial channel tile.
    batch, time, channels = 2, 8, 32
    x = jax.random.normal(k0, (batch, time, channels), dtype=jnp.float32) * 0.7 + 1.3
    out = jax.block_until_ready(instance_norm_1d(x))
    assert out.shape == (batch, time, channels)
    assert out.dtype == x.dtype
    assert jnp.allclose(out, _reference(x), atol=1e-4, rtol=1e-4), "mismatch (fused)"

    # Ragged channels (C % 128 != 0, >1 channel tile): masked tail tile, no pad/slice.
    x2 = jax.random.normal(k1, (2, 16, 200), dtype=jnp.float32)
    out2 = jax.block_until_ready(instance_norm_1d(x2, max_block_bytes=16 * 128 * 4))
    assert jnp.allclose(out2, _reference(x2), atol=1e-4, rtol=1e-4), "mismatch (ragged C)"

    # Long-sequence fallback (forced via a tiny block budget): time-tiled stats + apply,
    # including a masked partial time tile (T=40, TT=32).
    x3 = jax.random.normal(k2, (2, 40, 32), dtype=jnp.float32) + 2.0
    out3 = jax.block_until_ready(instance_norm_1d(x3, max_block_bytes=16 * 1024))
    assert jnp.allclose(out3, _reference(x3), atol=1e-3, rtol=1e-3), "mismatch (time-tiled)"

    print("KERNEL_OK")
</pallas_src>

<mosaic_0001>
module attributes {stable_mosaic.version = 11 : i64} {
  func.func @_fused_kernel(%arg0: i32, %arg1: i32, %arg2: memref<1x8x128xf32, #tpu.memory_space<vmem>>, %arg3: memref<1x8x128xf32, #tpu.memory_space<vmem>>) attributes {dimension_semantics = [#tpu.dimension_semantics<parallel>, #tpu.dimension_semantics<parallel>], iteration_bounds = array<i64: 2, 1>, scalar_prefetch = 0 : i64, scratch_operands = 0 : i64, tpu.core_type = #tpu.core_type<tc>, window_params = [{transform_indices = @transform_0, window_bounds = array<i64: 1, 8, 128>}, {transform_indices = @transform_1, window_bounds = array<i64: 1, 8, 128>}]} {
    %c0 = arith.constant 0 : index
    %c0_0 = arith.constant 0 : index
    %c0_1 = arith.constant 0 : index
    %0 = vector.load %arg2[%c0, %c0_0, %c0_1] : memref<1x8x128xf32, #tpu.memory_space<vmem>>, vector<1x8x128xf32>
    %cst = arith.constant dense<0.000000e+00> : vector<1x128xf32>
    %1 = vector.multi_reduction <add>, %0, %cst [1] : vector<1x8x128xf32> to vector<1x128xf32>
    %2 = vector.shape_cast %1 : vector<1x128xf32> to vector<1x1x128xf32>
    %cst_2 = arith.constant 1.250000e-01 : f32
    %3 = vector.broadcast %cst_2 : f32 to vector<1x1x128xf32>
    %4 = arith.mulf %2, %3 : vector<1x1x128xf32>
    %5 = vector.broadcast %4 : vector<1x1x128xf32> to vector<1x8x128xf32>
    %6 = arith.subf %0, %5 : vector<1x8x128xf32>
    %7 = arith.mulf %6, %6 : vector<1x8x128xf32>
    %cst_3 = arith.constant dense<0.000000e+00> : vector<1x128xf32>
    %8 = vector.multi_reduction <add>, %7, %cst_3 [1] : vector<1x8x128xf32> to vector<1x128xf32>
    %9 = vector.shape_cast %8 : vector<1x128xf32> to vector<1x1x128xf32>
    %cst_4 = arith.constant 1.250000e-01 : f32
    %10 = vector.broadcast %cst_4 : f32 to vector<1x1x128xf32>
    %11 = arith.mulf %9, %10 : vector<1x1x128xf32>
    %cst_5 = arith.constant 9.99999974E-6 : f32
    %12 = vector.broadcast %cst_5 : f32 to vector<1x1x128xf32>
    %13 = arith.addf %11, %12 : vector<1x1x128xf32>
    %14 = math.rsqrt %13 : vector<1x1x128xf32>
    %15 = vector.broadcast %14 : vector<1x1x128xf32> to vector<1x8x128xf32>
    %16 = arith.mulf %6, %15 : vector<1x8x128xf32>
    %c0_6 = arith.constant 0 : index
    %c0_7 = arith.constant 0 : index
    %c0_8 = arith.constant 0 : index
    %17 = vector.load %arg3[%c0_6, %c0_7, %c0_8] : memref<1x8x128xf32, #tpu.memory_space<vmem>>, vector<1x8x128xf32>
    tpu.vector_store %arg3[%c0_6, %c0_7, %c0_8], %16 {strides = array<i32>} : memref<1x8x128xf32, #tpu.memory_space<vmem>>, vector<1x8x128xf32>,
    return
  }
  func.func @transform_0(%arg0: i32, %arg1: i32) -> (i32, i32, i32) {
    %c0_i32 = arith.constant 0 : i32
    %c0_i32_0 = arith.constant 0 : i32
    return %arg0, %c0_i32, %arg1 : i32, i32, i32
  }
  func.func @transform_1(%arg0: i32, %arg1: i32) -> (i32, i32, i32) {
    %c0_i32 = arith.constant 0 : i32
    %c0_i32_0 = arith.constant 0 : i32
    return %arg0, %c0_i32, %arg1 : i32, i32, i32
  }
}

</mosaic_0001>

<bundles_post_ra>
// kernel: tpu_custom_call.1
= control target key start
LH: loop header
LB: loop body
LE: loop exit
PB: predicated region body
PF: predicated region fallthrough
CT: control target
= control target key end

     0   :  { %6 = vsyncpa [#allocation3], 0  ;;  %s640_s0 = inlined_call_operand.hbm [shape: f32[2,8,32], index: 0, kind: input, shape index: {}]   ;;  %s641_s1 = inlined_call_operand.hbm [shape: f32[2,8,32], index: 1, kind: output, shape index: {}]  }
   0x1   :  { %8 = vsyncpa [#allocation3 + $0x1], 0 }
   0x2   :  { %9 = vsyncpa [#allocation4], 0 }
   0x3   :  { %11 = vsyncpa [#allocation4 + $0x1], 0  ;;  %s468_s6 = smov 0   ;;  %s470_s7 = smov 0  }
   0x4   :  { %s472_s8 = smov 0   ;;  %s474_s9 = smov 0  }
   0x5   :  { %s476_s10 = smov 0   ;;  %s478_s11 = smov 0  }
   0x6 LB: > { %s265_s12 = sadd.s32 4294967295, %s454_s11   ;;  %s266_s13 = sadd.s32 4294967294, %s454_s11   ;;  %s454_s11 = sphi %s478_s11, %s17_s11   ;;  %s450_s10 = sphi %s476_s10, %s657_s10   ;;  %s446_s9 = sphi %s474_s9, %s656_s9   ;;  %s442_s8 = sphi %s472_s8, %s655_s8   ;;  %s438_s7 = sphi %s470_s7, %s654_s7   ;;  %s434_s6 = sphi %s468_s6, %s653_s6  }
   0x7   : > { %s29_s14 = sadd.s32 1, %s450_s10  ;;  %s38_s15 = sadd.s32 1, %s442_s8 }
   0x8   : > { %p31_p0 = scmp.ge.s32.totalorder %s29_s14, 2  ;;  %p45_p1 = scmp.ne.s32.totalorder %s442_s8, %s438_s7 }
   0x9   : > { %p46_p2 = scmp.eq.s32.totalorder %s454_s11, 0  ;;  %p51_p3 = scmp.ne.s32.totalorder %s438_s7, %s434_s6 }
   0xa   : > { %s659_s14 = smov (%p31_p0, %s29_s14), 0  ;;  %p52_p5 = scmp.eq.s32.totalorder %s265_s12, 0 }
   0xb   : > { %p509_p4 = por %p46_p2, %p45_p1  ;;  %s33_s17 = ssub.s32 %s450_s10, %s659_s14 }
   0xc   : > { %p77_p6 = scmp.eq.s32.totalorder %s265_s12, 1  ;;  %p36_p7 = scmp.eq.s32.totalorder %s33_s17, 0 }
   0xd   : > { %p515_p8 = por %p52_p5, %p51_p3  ;;  %p83_p10 = scmp.eq.s32.totalorder %s266_s13, 1 }
   0xe   : > { %p519_p9 = por %p77_p6, %p45_p1  ;;  %p290_p13 = scmp.lt.s32.totalorder %s454_s11, 2 }
   0xf   : > { %s524_s20 = scalar_select %p36_p7, %s442_s8, %s38_s15  }
  0x10   : > { %s645_s19 = scalar_select %p519_p9, 1, 0 }
  0x11   : > { %p526_p11 = por %p83_p10, %p51_p3  ;;  %s103_s22 = sand.u32 1, %s442_s8  }
  0x12   : > { %s269_s23 = sshll.u32 %s103_s22, 3  ;;  %s270_s24 = sshll.u32 %s450_s10, 7 }
  0x13   : > { %s646_s21 = scalar_select %p526_p11, 1, 0 }
  0x14   : > { %s537_s27 = scalar_lea.hbm %s640_s0, %s270_s24  ;;  %s107_s28 = scalar_lea.vmem [#allocation2], %s269_s23 }
  0x15   : > { %s115_s29 = sshll.u32 %s107_s28, 4  ;;  %p543_p0 = pnand %p290_p13, %p509_p4  ;;  %s539_s29 = int_to_ptr.vmem [resolvable:$true] %s115_s29 }
  0x16   : > { %s104_s2 = scalar_lea.sflag [#allocation3], %s103_s22  ;;  %s342_s3 = scalar_lea.hbm %s537_s27, 128 }
  0x17   : > { %p343_p3 = scmp.ne.s32.totalorder %s537_s27, %s342_s3  ;;  %p344_p5 = pneg %p543_p0 }
  0x18   : > { %s347_s12 = scalar_lea.hbm %s640_s0, 256  ;;  %p348_p4 = scmp.lt.u32.totalorder %s537_s27, %s640_s0 }
  0x19   : > { %p345_p6 = pnand %p344_p5, %p343_p3  ;;  %p349_p10 = scmp.lt.u32.totalorder %s347_s12, %s342_s3 }
  0x1a   : > { %p351_p12 = scmp.lt.u32.totalorder %s342_s3, %s537_s27 }
  0x1b   : > { %p346_p7 = pneg %p345_p6  ;;  %p350_p13 = por %p349_p10, %p348_p4 }
  0x1d   : > { %p352_p1 = por %p351_p12, %p350_p13 }
  0x1f   : > { %p353_p2 = pnand %p352_p1, %p346_p7 }
  0x21   : > { %356 = shalt.err (!%p353_p2)
}
  0x22   : > { %s357_s16 = scalar_lea.vmem %s539_s29, 128  ;;  %s456_s17 = smov [#allocation2]  }
  0x23   : > { %p358_p3 = scmp.ne.s32.totalorder %s539_s29, %s357_s16  ;;  %s362_s22 = sshll.u32 %s456_s17, 4  ;;  %s363_s22 = int_to_ptr.vmem [resolvable:$false] %s362_s22 }
  0x24   : > { %s364_s23 = scalar_lea.vmem %s363_s22, 256  ;;  %p365_p9 = scmp.lt.s32.totalorder %s539_s29, %s363_s22 }
  0x25   : > { %p360_p6 = pnand %p358_p3, %p344_p5  ;;  %p366_p4 = scmp.lt.s32.totalorder %s364_s23, %s357_s16 }
  0x27   : > { %p361_p11 = pneg %p360_p6  ;;  %p367_p10 = por %p366_p4, %p365_p9 }
  0x29   : > { %p368_p12 = pnand %p367_p10, %p361_p11 }
  0x2b   : > { %371 = shalt.err (!%p368_p12)
}
  0x2c   : > { %285 = dma.hbm_to_vmem [thread:$0]  (!%p543_p0), %s537_s27, 128, %s539_s29, %s104_s2  }
  0x2d   : > { %p648_p1 = scmp.lt.s32.totalorder %s454_s11, 3  ;;  %p649_p2 = scmp.ge.s32.totalorder %s454_s11, 1 }
  0x2f   : > { %p121_p5 = pnand %p649_p2, %p648_p1 }
  0x30   : > { %s579_s24 = sand.u32 (!%p121_p5), 1, %s438_s7  }
  0x31   : > { %124 = sbr.rel (%p121_p5) target bundleno = 119 (0x77), region = 24  ;;  %s272_s25 = sshll.u32 (!%p121_p5), %s579_s24, 3 }
  0x32   : > { %s127_s26 = scalar_lea.sflag (!%p121_p5), [#allocation3], %s579_s24  ;;  %s130_s28 = scalar_lea.vmem (!%p121_p5), [#allocation2], %s272_s25 }
  0x38   : > { %425 = dma.done.wait (%p515_p8), %s127_s26, 128  }
  0x39   : > { %427 = vsyncadd (%p515_p8), %s127_s26, 4294967168  ;;  %v149_v0 = vld [vmem:[%s130_s28] sm:$0xff]  ;;  %s148_s18 = scalar_lea.vmem [#allocation5], %s272_s25  ;;  %s275_s29 = sshll.u32 %s446_s9, 7 }
  0x3a   : > { %v150_v1 = vrot.slane %v149_v0, 4  ;;  %s185_s27 = sshll.u32 %s148_s18, 4  ;;  %s593_s3 = scalar_lea.hbm %s641_s1, %s275_s29  ;;  %s588_s27 = int_to_ptr.vmem [resolvable:$true] %s185_s27 }
  0x3b   : > { %s171_s4 = scalar_lea.sflag [#allocation4], %s579_s24  ;;  %s372_s5 = scalar_lea.vmem %s588_s27, 128 }
  0x3c   : > { %v151_v2 = vadd.f32 %v150_v1, %v149_v0  ;;  %p373_p8 = scmp.ne.s32.totalorder %s588_s27, %s372_s5  ;;  %p650_p9 = scmp.ne.s32.totalorder %s645_s19, 0 }
  0x3d   : > { %s457_s9 = smov [#allocation5]  }
  0x3e   : > { %v152_v3 = vrot.slane %v151_v2, 2  ;;  %p374_p11 = pnand %p373_p8, %p650_p9  ;;  %s376_s12 = sshll.u32 %s457_s9, 4  ;;  %s377_s12 = int_to_ptr.vmem [resolvable:$false] %s376_s12 }
  0x3f   : > { %s378_s13 = scalar_lea.vmem %s377_s12, 256  ;;  %p379_p7 = scmp.lt.s32.totalorder %s588_s27, %s377_s12 }
  0x40   : > { %v153_v4 = vadd.f32 %v152_v3, %v151_v2  ;;  %p375_p0 = pneg %p374_p11  ;;  %p380_p13 = scmp.lt.s32.totalorder %s378_s13, %s372_s5 }
  0x42   : > { %v154_v5 = vrot.slane %v153_v4, 1  ;;  %p381_p3 = por %p380_p13, %p379_p7 }
  0x44   : > { %v155_v6 = vadd.f32 %v154_v5, %v153_v4  ;;  %p382_p6 = pnand %p381_p3, %p375_p0 }
  0x46   : > { %v156_v7 = vmul.f32 0.125, %v155_v6 }
  0x48   : > { %v157_v8 = vsub.f32 %v149_v0, %v156_v7 }
  0x4a   : > { %v158_v9 = vmul.f32 %v157_v8, %v157_v8 }
  0x4c   : > { %v159_v10 = vrot.slane %v158_v9, 4 }
  0x4e   : > { %v160_v11 = vadd.f32 %v159_v10, %v158_v9 }
  0x50   : > { %v161_v12 = vrot.slane %v160_v11, 2 }
  0x52   : > { %v162_v13 = vadd.f32 %v161_v12, %v160_v11 }
  0x54   : > { %v163_v14 = vrot.slane %v162_v13, 1 }
  0x56   : > { %v164_v15 = vadd.f32 %v163_v14, %v162_v13 }
  0x58   : > { %v165_v16 = vmul.f32 0.125, %v164_v15 }
  0x5a   : > { %v166_v17 = vadd.f32 1e-05, %v165_v16 }
  0x5c   : > { %340 = vrsqrt.f32 %v166_v17 }
  0x66   : > { %v341_v18 = vpop.eup %340 }
  0x67   : > { %v168_v19 = vmul.f32 %v341_v18, %v157_v8 }
  0x69   : > { %169 = vst [vmem:[%s148_s18] sm:$0xff] %v168_v19 }
  0x6a   : > { %385 = shalt.err (!%p382_p6)
}
  0x6b   : > { %s386_s15 = scalar_lea.hbm %s593_s3, 128  ;;  %s390_s22 = scalar_lea.hbm %s641_s1, 256 }
  0x6c   : > { %p387_p4 = scmp.ne.s32.totalorder %s593_s3, %s386_s15  ;;  %p391_p1 = scmp.lt.u32.totalorder %s593_s3, %s641_s1 }
  0x6d   : > { %p392_p2 = scmp.lt.u32.totalorder %s390_s22, %s386_s15  ;;  %p394_p8 = scmp.lt.u32.totalorder %s386_s15, %s593_s3 }
  0x6e   : > { %p388_p10 = pnand %p387_p4, %p650_p9 }
  0x6f   : > { %p393_p5 = por %p392_p2, %p391_p1 }
  0x70   : > { %p389_p12 = pneg %p388_p10 }
  0x71   : > { %p395_p11 = por %p394_p8, %p393_p5 }
  0x73   : > { %p396_p0 = pnand %p395_p11, %p389_p12 }
  0x75   : > { %399 = shalt.err (!%p396_p0)
}
  0x76   : > { %280 = dma.vmem_to_hbm [thread:$0]  (%p650_p9), %s588_s27, 128, %s593_s3, %s171_s4  }
  0x77 PF: > { %s197_s25 = sand.u32 1, %s434_s6   ;;  %p651_p7 = scmp.ne.s32.totalorder %s646_s21, 0 }
  0x78   : > { %p652_p13 = scmp.ge.s32.totalorder %s454_s11, 2  ;;  %s198_s26 = scalar_lea.sflag [#allocation4], %s197_s25 }
  0x7a   : > { %p287_p3 = pnand %p652_p13, %p651_p7 }
  0x7c   : > { %429 = dma.done.wait (!%p287_p3), %s198_s26, 128  }
  0x7d   : > { %431 = vsyncadd (!%p287_p3), %s198_s26, 4294967168  ;;  %s17_s11 = sadd.s32 1, %s454_s11   ;;  %s653_s6 = smov %s438_s7 }
  0x7e   : > { %p14_p6 = scmp.ge.s32.totalorder %s17_s11, 4   ;;  %s654_s7 = smov %s442_s8 }
  0x7f   : > { %s655_s8 = smov %s524_s20  ;;  %s656_s9 = smov %s450_s10 }
  0x80   : > { %s657_s10 = smov %s659_s14  ;;  %16 = sbr.rel (!%p14_p6) target bundleno = 6 (0x6), region = 69 }
  0x87   :  { %203 = vsyncpa [#allocation3], 1 }
  0x88   :  { %205 = vsyncpa [#allocation3 + $0x1], 1 }
  0x89   :  { %206 = vsyncpa [#allocation4], 1 }
  0x8a   :  { %208 = vsyncpa [#allocation4 + $0x1], 1 }

</bundles_post_ra>
